<compile_context>
chip_gen: v7x
topology: tpu7x:2x2x1
jax: 0.10.0
libtpu: 0.0.40
codegen_flags: <defaults>
</compile_context>

<pallas_src>
import functools

import jax
import jax.numpy as jnp
from jax.experimental import pallas as pl
from jax.experimental.pallas import tpu as pltpu

QPAD = 8  # sublane-tile padding so every packed row slice stays 8-aligned


def _pixels_per_tile(P, N, target_lanes=2048):
    """Largest pixels-per-tile dividing P with tile*N <= target lanes and a
    128-aligned (or full-extent) lane width."""
    for ppt in range(P, 0, -1):
        if P % ppt:
            continue
        tpn = ppt * N
        if tpn <= max(target_lanes, N) and (tpn % 128 == 0 or ppt == P):
            return ppt
    return P


def _vmem_estimate_bytes(d, tile_pn, ppt):
    f32, bf16, dbl = 4, 2, 2
    blocks = dbl * (
        (d + QPAD) * tile_pn * bf16          # x block
        + d * tile_pn * f32                  # output block
        + (QPAD + 2 * d) * (d + QPAD) * bf16 # packed qkv weight (+bias cols)
        + d * d * bf16                       # out_proj weight
        + d * tile_pn * f32                  # out_proj bias (pre-broadcast)
        + 2 * ppt * tile_pn * f32            # neg_mask + e_mat
        + tile_pn * tile_pn * bf16           # block-diagonal ones matrix
    )
    scratch = (d + QPAD) * tile_pn * bf16    # stacked [k*e ; e] LHS
    temps = (
        (QPAD + 2 * d) * tile_pn * f32       # y (qkv projection)
        + (d + QPAD) * tile_pn * f32         # y2 (segment sums)
        + 3 * d * tile_pn * f32              # k*e / out / o style temporaries
    )
    return blocks + scratch + temps


def _lsa_kernel(x_ref, wqkv_ref, wo_ref, bo_ref, negm_ref, emat_ref, bseg_ref,
                o_ref, kse_ref, *, d):
    x = x_ref[0]                                                  # (d+8, T) bf16

    # Fused qkv projection; b_qkv is folded into the matmul via the ones row
    # appended to x in the wrapper (no per-step bias load/broadcast).
    y = jnp.dot(wqkv_ref[...], x,
                preferred_element_type=jnp.float32)               # (8+2d, T) f32
    q = y[0:1, :]                                                 # (1, T)
    k = y[QPAD:QPAD + d, :]                                       # (d, T)
    v = y[QPAD + d:QPAD + 2 * d, :]                               # (d, T)

    # Per-pixel (N-lane segment) max for a numerically stable softmax.
    q_seg = q + negm_ref[...]                                     # (ppt, T)
    seg_max = jnp.max(q_seg, axis=1, keepdims=True)               # (ppt, 1)
    max_flat = jnp.sum(seg_max * emat_ref[...], axis=0,
                       keepdims=True)                             # (1, T)
    e = jnp.exp(q - max_flat)                                     # (1, T) f32

    # ONE bf16 MXU matmul with the block-diagonal ones matrix gives BOTH the
    # softmax denominator and the unnormalised context vector, each already
    # broadcast back over its pixel's N lanes (single weight push, K = T).
    kse_ref[0:d, :] = (k * e).astype(kse_ref.dtype)
    kse_ref[d:d + QPAD, :] = jnp.broadcast_to(
        e, (QPAD, e.shape[1])).astype(kse_ref.dtype)
    y2 = jnp.dot(kse_ref[...], bseg_ref[...],
                 preferred_element_type=jnp.float32)              # (d+8, T) f32
    cv_flat = y2[0:d, :]                                          # sum_seg(k*e)
    inv_den = pl.reciprocal(y2[d:d + 1, :], approx=True)          # 1/sum_seg(e)

    # out = relu(v) * context_vector   (attn_dropout = 0 -> identity)
    out = jnp.maximum(v, 0.0) * (cv_flat * inv_den)               # (d, T) f32

    # out_proj (1x1 conv) with pre-broadcast bias; lane-dense (d, T) store.
    o = jnp.dot(wo_ref[...], out.astype(jnp.bfloat16),
                preferred_element_type=jnp.float32) + bo_ref[...]
    o_ref[0] = o.astype(o_ref.dtype)


def linear_self_attention(x_nchw, w_qkv, b_qkv, w_out, b_out, *,
                          target_lanes=2048):
    """x_nchw: (B, d, P, N) f32 -> (B, d, P, N) f32 (PyTorch NCHW semantics)."""
    B, d, P, N = x_nchw.shape
    PN = P * N
    ppt = _pixels_per_tile(P, N, target_lanes)
    tile_pn = ppt * N
    n_tiles = P // ppt

    # ---- wrapper-side packing: free reshapes + tiny concats; the only HBM
    # pass over x is the f32->bf16 cast we need anyway (ones row rides along
    # so the qkv bias folds into the MXU matmul) ----
    x_flat = x_nchw.reshape(B, d, PN).astype(jnp.bfloat16)
    ones_pad = jnp.zeros((B, QPAD, PN), jnp.bfloat16).at[:, 0, :].set(1.0)
    x_aug = jnp.concatenate([x_flat, ones_pad], axis=1)           # (B, d+8, PN)

    w_q, w_k, w_v = w_qkv[0:1], w_qkv[1:1 + d], w_qkv[1 + d:]
    b_q, b_k, b_v = b_qkv[0:1], b_qkv[1:1 + d], b_qkv[1 + d:]
    w_rows = jnp.concatenate(
        [w_q, jnp.zeros((QPAD - 1, d), w_qkv.dtype), w_k, w_v], axis=0)
    b_rows = jnp.concatenate(
        [b_q, jnp.zeros((QPAD - 1,), b_qkv.dtype), b_k, b_v], axis=0)
    bias_cols = jnp.zeros((QPAD + 2 * d, QPAD), w_qkv.dtype).at[:, 0].set(b_rows)
    w_aug = jnp.concatenate([w_rows, bias_cols],
                            axis=1).astype(jnp.bfloat16)          # (8+2d, d+8)

    wo = w_out.astype(jnp.bfloat16)                               # (d, d)
    bo_b = jnp.broadcast_to(b_out.astype(jnp.float32)[:, None],
                            (d, tile_pn))                         # (d, tile_pn)

    # ---- loop-invariant per-tile segment matrices, hoisted out of the body.
    # Tiles are pixel-aligned, so one template serves every grid step. ----
    col_pix = jnp.arange(tile_pn) // N
    in_seg = col_pix[None, :] == jnp.arange(ppt)[:, None]         # (ppt, tile)
    e_mat = in_seg.astype(jnp.float32)
    neg_mask = jnp.where(in_seg, 0.0, -1e30).astype(jnp.float32)
    bseg = (col_pix[:, None] == col_pix[None, :]).astype(jnp.bfloat16)

    vmem_limit = int(min(100 * 2 ** 20,
                         max(32 * 2 ** 20,
                             2 * _vmem_estimate_bytes(d, tile_pn, ppt))))

    # TODO(synk): on single-TC v5e/v6e with large B and tiny d*PN, block a few
    # batch elements per grid step to amortize the ~600-cycle step overhead.
    out = pl.pallas_call(
        functools.partial(_lsa_kernel, d=d),
        out_shape=jax.ShapeDtypeStruct((B, d, PN), jnp.float32),
        grid_spec=pltpu.PrefetchScalarGridSpec(
            num_scalar_prefetch=0,
            grid=(B, n_tiles),
            in_specs=[
                pl.BlockSpec((1, d + QPAD, tile_pn), lambda b, t: (b, 0, t)),  # x
                pl.BlockSpec((QPAD + 2 * d, d + QPAD), lambda b, t: (0, 0)),   # w_qkv
                pl.BlockSpec((d, d), lambda b, t: (0, 0)),                     # w_out
                pl.BlockSpec((d, tile_pn), lambda b, t: (0, 0)),               # b_out
                pl.BlockSpec((ppt, tile_pn), lambda b, t: (0, 0)),             # neg mask
                pl.BlockSpec((ppt, tile_pn), lambda b, t: (0, 0)),             # e_mat
                pl.BlockSpec((tile_pn, tile_pn), lambda b, t: (0, 0)),         # B_seg
            ],
            out_specs=pl.BlockSpec((1, d, tile_pn), lambda b, t: (b, 0, t)),
            scratch_shapes=[pltpu.VMEM((d + QPAD, tile_pn), jnp.bfloat16)],
        ),
        compiler_params=pltpu.CompilerParams(
            dimension_semantics=("parallel", "parallel"),
            vmem_limit_bytes=vmem_limit),
    )(x_aug, w_aug, wo, bo_b, neg_mask, e_mat, bseg)

    return out.reshape(B, d, P, N)                                # free reshape


def reference(x, w_qkv, b_qkv, w_out, b_out):
    """Pure-JAX (f32) reference reproducing the PyTorch forward semantics."""
    d = x.shape[1]
    qkv = jnp.einsum('oc,bcpn->bopn', w_qkv, x) + b_qkv[None, :, None, None]
    q, k, v = qkv[:, 0:1], qkv[:, 1:1 + d], qkv[:, 1 + d:]
    score = jax.nn.softmax(q, axis=-1)                  # softmax over N
    cv = jnp.sum(k * score, axis=-1, keepdims=True)     # (B, d, P, 1)
    out = jax.nn.relu(v) * cv
    return jnp.einsum('oc,bcpn->bopn', w_out, out) + b_out[None, :, None, None]


if __name__ == "__main__":
    B, d, P, N = 2, 32, 4, 64   # batch, embed_dim, pixels-per-patch, num patches
    key = jax.random.PRNGKey(0)
    k0, k1, k2, k3, k4 = jax.random.split(key, 5)

    x = jax.random.normal(k0, (B, d, P, N), jnp.float32)
    # qkv_proj: Conv2d(d, 1+2d, 1, bias=True) / out_proj: Conv2d(d, d, 1, bias=True)
    w_qkv = 0.1 * jax.random.normal(k1, (1 + 2 * d, d), jnp.float32)
    b_qkv = 0.1 * jax.random.normal(k2, (1 + 2 * d,), jnp.float32)
    w_out = 0.1 * jax.random.normal(k3, (d, d), jnp.float32)
    b_out = 0.1 * jax.random.normal(k4, (d,), jnp.float32)

    out = linear_self_attention(x, w_qkv, b_qkv, w_out, b_out)
    out = jax.block_until_ready(out)

    ref = reference(x, w_qkv, b_qkv, w_out, b_out)
    assert out.shape == (B, d, P, N), out.shape
    max_err = float(jnp.max(jnp.abs(out - ref)))
    # bf16 MXU operands (f32 accumulation) + approx reciprocal -> loose tol.
    assert jnp.allclose(out, ref, atol=5e-2, rtol=5e-2), max_err
    print("KERNEL_OK")
</pallas_src>

<mosaic_0001>
module attributes {stable_mosaic.version = 11 : i64} {
  func.func @_lsa_kernel(%arg0: i32, %arg1: i32, %arg2: memref<1x40x256xbf16, #tpu.memory_space<vmem>>, %arg3: memref<72x40xbf16, #tpu.memory_space<vmem>>, %arg4: memref<32x32xbf16, #tpu.memory_space<vmem>>, %arg5: memref<32x256xf32, #tpu.memory_space<vmem>>, %arg6: memref<4x256xf32, #tpu.memory_space<vmem>>, %arg7: memref<4x256xf32, #tpu.memory_space<vmem>>, %arg8: memref<256x256xbf16, #tpu.memory_space<vmem>>, %arg9: memref<1x32x256xf32, #tpu.memory_space<vmem>>, %arg10: memref<40x256xbf16, #tpu.memory_space<vmem>>) attributes {dimension_semantics = [#tpu.dimension_semantics<parallel>, #tpu.dimension_semantics<parallel>], iteration_bounds = array<i64: 2, 1>, scalar_prefetch = 0 : i64, scratch_operands = 1 : i64, tpu.core_type = #tpu.core_type<tc>, window_params = [{transform_indices = @transform_0, window_bounds = array<i64: 1, 40, 256>}, {pipeline_mode = #tpu.pipeline_mode<synchronous>, transform_indices = @transform_1, window_bounds = array<i64: 72, 40>}, {pipeline_mode = #tpu.pipeline_mode<synchronous>, transform_indices = @transform_2, window_bounds = array<i64: 32, 32>}, {pipeline_mode = #tpu.pipeline_mode<synchronous>, transform_indices = @transform_3, window_bounds = array<i64: 32, 256>}, {pipeline_mode = #tpu.pipeline_mode<synchronous>, transform_indices = @transform_4, window_bounds = array<i64: 4, 256>}, {pipeline_mode = #tpu.pipeline_mode<synchronous>, transform_indices = @transform_5, window_bounds = array<i64: 4, 256>}, {pipeline_mode = #tpu.pipeline_mode<synchronous>, transform_indices = @transform_6, window_bounds = array<i64: 256, 256>}, {transform_indices = @transform_7, window_bounds = array<i64: 1, 32, 256>}]} {
    %c0 = arith.constant 0 : index
    %c0_0 = arith.constant 0 : index
    %c0_1 = arith.constant 0 : index
    %0 = vector.load %arg2[%c0, %c0_0, %c0_1] : memref<1x40x256xbf16, #tpu.memory_space<vmem>>, vector<1x40x256xbf16>
    %1 = vector.shape_cast %0 : vector<1x40x256xbf16> to vector<40x256xbf16>
    %c0_2 = arith.constant 0 : index
    %c0_3 = arith.constant 0 : index
    %2 = vector.load %arg3[%c0_2, %c0_3] : memref<72x40xbf16, #tpu.memory_space<vmem>>, vector<72x40xbf16>
    %cst = arith.constant dense<0.000000e+00> : vector<72x256xf32>
    %3 = tpu.matmul %2, %1, %cst {dimension_numbers = #tpu.dot_dimension_numbers<[1], [0], [0], [1], [0, 0, 1, 1], [], []>} : vector<72x40xbf16>, vector<40x256xbf16>, vector<72x256xf32> -> vector<72x256xf32>
    %4 = vector.extract_strided_slice %3 {offsets = [0, 0], sizes = [1, 256], strides = [1, 1]} : vector<72x256xf32> to vector<1x256xf32>
    %5 = vector.extract_strided_slice %3 {offsets = [8, 0], sizes = [32, 256], strides = [1, 1]} : vector<72x256xf32> to vector<32x256xf32>
    %6 = vector.extract_strided_slice %3 {offsets = [40, 0], sizes = [32, 256], strides = [1, 1]} : vector<72x256xf32> to vector<32x256xf32>
    %c0_4 = arith.constant 0 : index
    %c0_5 = arith.constant 0 : index
    %7 = vector.load %arg6[%c0_4, %c0_5] : memref<4x256xf32, #tpu.memory_space<vmem>>, vector<4x256xf32>
    %8 = vector.broadcast %4 : vector<1x256xf32> to vector<4x256xf32>
    %9 = arith.addf %8, %7 : vector<4x256xf32>
    %cst_6 = arith.constant dense<0xFF800000> : vector<4xf32>
    %10 = vector.multi_reduction <maximumf>, %9, %cst_6 [1] : vector<4x256xf32> to vector<4xf32>
    %11 = vector.shape_cast %10 : vector<4xf32> to vector<4x1xf32>
    %c0_7 = arith.constant 0 : index
    %c0_8 = arith.constant 0 : index
    %12 = vector.load %arg7[%c0_7, %c0_8] : memref<4x256xf32, #tpu.memory_space<vmem>>, vector<4x256xf32>
    %13 = vector.broadcast %11 : vector<4x1xf32> to vector<4x256xf32>
    %14 = arith.mulf %13, %12 : vector<4x256xf32>
    %cst_9 = arith.constant dense<0.000000e+00> : vector<256xf32>
    %15 = vector.multi_reduction <add>, %14, %cst_9 [0] : vector<4x256xf32> to vector<256xf32>
    %16 = vector.shape_cast %15 : vector<256xf32> to vector<1x256xf32>
    %17 = arith.subf %4, %16 : vector<1x256xf32>
    %18 = math.exp %17 : vector<1x256xf32>
    %19 = vector.broadcast %18 : vector<1x256xf32> to vector<32x256xf32>
    %20 = arith.mulf %5, %19 : vector<32x256xf32>
    %21 = arith.truncf %20 : vector<32x256xf32> to vector<32x256xbf16>
    %c0_10 = arith.constant 0 : index
    %c0_11 = arith.constant 0 : index
    %22 = vector.load %arg10[%c0_10, %c0_11] : memref<40x256xbf16, #tpu.memory_space<vmem>>, vector<32x256xbf16>
    tpu.vector_store %arg10[%c0_10, %c0_11], %21 {strides = array<i32>} : memref<40x256xbf16, #tpu.memory_space<vmem>>, vector<32x256xbf16>,
    %23 = vector.shape_cast %18 : vector<1x256xf32> to vector<1x256xf32>
    %24 = vector.broadcast %23 : vector<1x256xf32> to vector<8x256xf32>
    %25 = arith.truncf %24 : vector<8x256xf32> to vector<8x256xbf16>
    %c32 = arith.constant 32 : index
    %c0_12 = arith.constant 0 : index
    %26 = vector.load %arg10[%c32, %c0_12] : memref<40x256xbf16, #tpu.memory_space<vmem>>, vector<8x256xbf16>
    tpu.vector_store %arg10[%c32, %c0_12], %25 {strides = array<i32>} : memref<40x256xbf16, #tpu.memory_space<vmem>>, vector<8x256xbf16>,
    %c0_13 = arith.constant 0 : index
    %c0_14 = arith.constant 0 : index
    %27 = vector.load %arg10[%c0_13, %c0_14] : memref<40x256xbf16, #tpu.memory_space<vmem>>, vector<40x256xbf16>
    %c0_15 = arith.constant 0 : index
    %c0_16 = arith.constant 0 : index
    %28 = vector.load %arg8[%c0_15, %c0_16] : memref<256x256xbf16, #tpu.memory_space<vmem>>, vector<256x256xbf16>
    %cst_17 = arith.constant dense<0.000000e+00> : vector<40x256xf32>
    %29 = tpu.matmul %27, %28, %cst_17 {dimension_numbers = #tpu.dot_dimension_numbers<[1], [0], [0], [1], [0, 0, 1, 1], [], []>} : vector<40x256xbf16>, vector<256x256xbf16>, vector<40x256xf32> -> vector<40x256xf32>
    %30 = vector.extract_strided_slice %29 {offsets = [0, 0], sizes = [32, 256], strides = [1, 1]} : vector<40x256xf32> to vector<32x256xf32>
    %31 = vector.extract_strided_slice %29 {offsets = [32, 0], sizes = [1, 256], strides = [1, 1]} : vector<40x256xf32> to vector<1x256xf32>
    %32 = tpu.reciprocal %31 {approx = true} : vector<1x256xf32> -> vector<1x256xf32>
    %cst_18 = arith.constant 0.000000e+00 : f32
    %33 = vector.broadcast %cst_18 : f32 to vector<32x256xf32>
    %34 = arith.maximumf %6, %33 : vector<32x256xf32>
    %35 = vector.broadcast %32 : vector<1x256xf32> to vector<32x256xf32>
    %36 = arith.mulf %30, %35 : vector<32x256xf32>
    %37 = arith.mulf %34, %36 : vector<32x256xf32>
    %c0_19 = arith.constant 0 : index
    %c0_20 = arith.constant 0 : index
    %38 = vector.load %arg4[%c0_19, %c0_20] : memref<32x32xbf16, #tpu.memory_space<vmem>>, vector<32x32xbf16>
    %39 = arith.truncf %37 : vector<32x256xf32> to vector<32x256xbf16>
    %cst_21 = arith.constant dense<0.000000e+00> : vector<32x256xf32>
    %40 = tpu.matmul %38, %39, %cst_21 {dimension_numbers = #tpu.dot_dimension_numbers<[1], [0], [0], [1], [0, 0, 1, 1], [], []>} : vector<32x32xbf16>, vector<32x256xbf16>, vector<32x256xf32> -> vector<32x256xf32>
    %c0_22 = arith.constant 0 : index
    %c0_23 = arith.constant 0 : index
    %41 = vector.load %arg5[%c0_22, %c0_23] : memref<32x256xf32, #tpu.memory_space<vmem>>, vector<32x256xf32>
    %42 = arith.addf %40, %41 : vector<32x256xf32>
    %c0_24 = arith.constant 0 : index
    %c0_25 = arith.constant 0 : index
    %c0_26 = arith.constant 0 : index
    %43 = vector.load %arg9[%c0_24, %c0_25, %c0_26] : memref<1x32x256xf32, #tpu.memory_space<vmem>>, vector<1x32x256xf32>
    %44 = vector.shape_cast %43 : vector<1x32x256xf32> to vector<32x256xf32>
    %45 = vector.shape_cast %42 : vector<32x256xf32> to vector<1x32x256xf32>
    tpu.vector_store %arg9[%c0_24, %c0_25, %c0_26], %45 {strides = array<i32>} : memref<1x32x256xf32, #tpu.memory_space<vmem>>, vector<1x32x256xf32>,
    return
  }
  func.func @transform_0(%arg0: i32, %arg1: i32) -> (i32, i32, i32) {
    %c0_i32 = arith.constant 0 : i32
    %c0_i32_0 = arith.constant 0 : i32
    return %arg0, %c0_i32, %arg1 : i32, i32, i32
  }
  func.func @transform_1(%arg0: i32, %arg1: i32) -> (i32, i32) {
    %c0_i32 = arith.constant 0 : i32
    %c0_i32_0 = arith.constant 0 : i32
    %c0_i32_1 = arith.constant 0 : i32
    return %c0_i32, %c0_i32_0 : i32, i32
  }
  func.func @transform_2(%arg0: i32, %arg1: i32) -> (i32, i32) {
    %c0_i32 = arith.constant 0 : i32
    %c0_i32_0 = arith.constant 0 : i32
    %c0_i32_1 = arith.constant 0 : i32
    return %c0_i32, %c0_i32_0 : i32, i32
  }
  func.func @transform_3(%arg0: i32, %arg1: i32) -> (i32, i32) {
    %c0_i32 = arith.constant 0 : i32
    %c0_i32_0 = arith.constant 0 : i32
    %c0_i32_1 = arith.constant 0 : i32
    return %c0_i32, %c0_i32_0 : i32, i32
  }
  func.func @transform_4(%arg0: i32, %arg1: i32) -> (i32, i32) {
    %c0_i32 = arith.constant 0 : i32
    %c0_i32_0 = arith.constant 0 : i32
    %c0_i32_1 = arith.constant 0 : i32
    return %c0_i32, %c0_i32_0 : i32, i32
  }
  func.func @transform_5(%arg0: i32, %arg1: i32) -> (i32, i32) {
    %c0_i32 = arith.constant 0 : i32
    %c0_i32_0 = arith.constant 0 : i32
    %c0_i32_1 = arith.constant 0 : i32
    return %c0_i32, %c0_i32_0 : i32, i32
  }
  func.func @transform_6(%arg0: i32, %arg1: i32) -> (i32, i32) {
    %c0_i32 = arith.constant 0 : i32
    %c0_i32_0 = arith.constant 0 : i32
    %c0_i32_1 = arith.constant 0 : i32
    return %c0_i32, %c0_i32_0 : i32, i32
  }
  func.func @transform_7(%arg0: i32, %arg1: i32) -> (i32, i32, i32) {
    %c0_i32 = arith.constant 0 : i32
    %c0_i32_0 = arith.constant 0 : i32
    return %arg0, %c0_i32, %arg1 : i32, i32, i32
  }
}

</mosaic_0001>

<bundles_post_ra>
// kernel: tpu_custom_call.1
= control target key start
LH: loop header
LB: loop body
LE: loop exit
PB: predicated region body
PF: predicated region fallthrough
CT: control target
= control target key end

     0   :  { %s2070_s0 = inlined_call_operand.hbm [shape: bf16[2,40,256], index: 0, kind: input, shape index: {}]   ;;  %s2071_s1 = inlined_call_operand.vmem [shape: bf16[72,40], index: 1, kind: input, shape index: {}]   ;;  %s2072_s2 = inlined_call_operand.hbm [shape: bf16[32,32], index: 2, kind: input, shape index: {}]   ;;  %s2073_s3 = inlined_call_operand.vmem [shape: f32[32,256], index: 3, kind: input, shape index: {}]   ;;  %s2074_s4 = inlined_call_operand.hbm [shape: f32[4,256], index: 4, kind: input, shape index: {}]   ;;  %s2075_s5 = inlined_call_operand.vmem [shape: f32[4,256], index: 5, kind: input, shape index: {}]   ;;  %s2076_s6 = inlined_call_operand.hbm [shape: bf16[256,256], index: 6, kind: input, shape index: {}]   ;;  %s2077_s7 = inlined_call_operand.hbm [shape: f32[2,32,256], index: 7, kind: output, shape index: {}]  }
   0x1   :  { %2086 = sst [smem:[#allocation19_spill]] %s2077_s7 }
   0x2   :  { %12 = vsyncpa [#allocation4], 0 }
   0x3   :  { %14 = vsyncpa [#allocation4 + $0x1], 0 }
   0x4   :  { %15 = vsyncpa [#allocation7], 0 }
   0x5   :  { %16 = vsyncpa [#allocation10], 0 }
   0x6   :  { %17 = vsyncpa [#allocation5], 0 }
   0x7   :  { %19 = vsyncpa [#allocation5 + $0x1], 0  ;;  %s1697_s24 = smov 0   ;;  %s1699_s25 = smov 0  }
   0x8   :  { %s1701_s26 = smov 0   ;;  %s1703_s27 = smov 0  }
   0x9   :  { %s1705_s28 = smov 0   ;;  %s1707_s29 = smov 0  }
   0xa LB: > { %2087 = sst [smem:[#allocation16_spill]] %s1623_s24  ;;  %s1169_s30 = sadd.s32 4294967295, %s1643_s29   ;;  %s1643_s29 = sphi %s1707_s29, %s25_s29   ;;  %s1639_s28 = sphi %s1705_s28, %s2115_s28   ;;  %s1635_s27 = sphi %s1703_s27, %s2114_s27   ;;  %s1631_s26 = sphi %s1701_s26, %s2113_s26   ;;  %s1627_s25 = sphi %s1699_s25, %s2112_s25   ;;  %s1623_s24 = sphi %s1697_s24, %s2111_s24  }
   0xb   : > { %2088 = sst [smem:[#allocation17_spill]] %s1635_s27  ;;  %s1170_s8 = sadd.s32 4294967294, %s1643_s29  }
   0xc   : > { %p59_p0 = scmp.ne.s32.totalorder %s1627_s25, %s1623_s24  ;;  %p1731_p1 = scmp.eq.s32.totalorder %s1169_s30, 0 }
   0xd   : > { %p1735_p2 = scmp.eq.s32.totalorder %s1169_s30, 1  ;;  %p217_p3 = scmp.eq.s32.totalorder %s1170_s8, 1 }
   0xe   : > { %s2089_s9 = scalar_select %p1731_p1, 1, 0 }
   0xf   : > { %s2090_s10 = scalar_select %p1735_p2, 1, 0 }
  0x10   : > { %p1741_p4 = por %p1731_p1, %p59_p0  ;;  %p1171_p5 = scmp.ge.s32.totalorder %s1643_s29, 1 }
  0x11   : > { %p1746_p6 = por %p217_p3, %p59_p0  ;;  %p224_p7 = scmp.lt.s32.totalorder %s1643_s29, 3 }
  0x12   : > { %s2091_s11 = scalar_select %p1741_p4, 1, 0 }
  0x13   : > { %s2092_s12 = scalar_select %p1746_p6, 1, 0 }
  0x14   : > { %p1751_p8 = pnand %p1171_p5, %p224_p7  ;;  %s1645_s14 = smov [#allocation6]  }
  0x15   : > { %2093 = sst [smem:[#allocation18_spill]] %s2092_s12  ;;  %s239_s15 = sshll.u32 %s1645_s14, 4  ;;  %s1755_s15 = int_to_ptr.vmem [resolvable:$true] %s239_s15 }
  0x16   : > { %s2094_s13 = scalar_select %p1751_p8, 1, 0 }
  0x17   : > { %p1282_p9 = pneg %p1751_p8  ;;  %s1646_s17 = smov [#allocation8]  }
  0x18   : > { %s256_s18 = sshll.u32 %s1646_s17, 4  ;;  %s1647_s19 = smov [#allocation9]   ;;  %s1766_s18 = int_to_ptr.vmem [resolvable:$true] %s256_s18 }
  0x19   : > { %p1762_p11 = pnand %p1282_p9, %p1731_p1  ;;  %s1768_s20 = sshll.u32 %s1647_s19, 4  ;;  %s270_s20 = int_to_ptr.vmem [resolvable:$true] %s1768_s20 }
  0x1a   : > { %s1439_s23 = scalar_lea.hbm %s2072_s2, 256 }
  0x1b   : > { %p1440_p12 = scmp.ne.s32.totalorder %s2072_s2, %s1439_s23  ;;  %p1778_p13 = pneg %p1762_p11 }
  0x1c   : > { %p1446_p5 = scmp.lt.u32.totalorder %s1439_s23, %s2072_s2 }
  0x1d   : > { %p1442_p0 = pnand %p1778_p13, %p1440_p12 }
  0x1f   : > { %p1443_p3 = pneg %p1442_p0 }
  0x21   : > { %p1448_p7 = pnand %p1446_p5, %p1443_p3 }
  0x23   : > { %1451 = shalt.err (!%p1448_p7)
}
  0x24   : > { %s1452_s21 = scalar_lea.vmem %s1755_s15, 256  ;;  %p1460_p1 = scmp.lt.s32.totalorder %s1755_s15, %s1755_s15 }
  0x25   : > { %p1453_p9 = scmp.ne.s32.totalorder %s1755_s15, %s1452_s21  ;;  %p1461_p4 = scmp.lt.s32.totalorder %s1452_s21, %s1452_s21 }
  0x27   : > { %p1455_p10 = pnand %p1453_p9, %p1778_p13  ;;  %p1462_p12 = por %p1461_p4, %p1460_p1 }
  0x29   : > { %p1456_p6 = pneg %p1455_p10 }
  0x2b   : > { %p1463_p0 = pnand %p1462_p12, %p1456_p6 }
  0x2d   : > { %1466 = shalt.err (!%p1463_p0)
}
  0x2e   : > { %s1648_s22 = smov 64   ;;  %s1649_s23 = smov 4  }
  0x2f   : > { %1285 = dma.hbm_to_vmem [thread:$0]  (!%p1762_p11), %s2072_s2, 256, %s1755_s15, [#allocation7], %s1648_s22, %s1648_s22, %s1649_s23  }
  0x30   : > { %s1467_s12 = scalar_lea.hbm %s2074_s4, 128 }
  0x31   : > { %p1468_p1 = scmp.ne.s32.totalorder %s2074_s4, %s1467_s12  ;;  %p1474_p10 = scmp.lt.u32.totalorder %s1467_s12, %s2074_s4 }
  0x33   : > { %p1470_p4 = pnand %p1468_p1, %p1778_p13 }
  0x35   : > { %p1471_p6 = pneg %p1470_p4 }
  0x37   : > { %p1476_p3 = pnand %p1474_p10, %p1471_p6 }
  0x39   : > { %1479 = shalt.err (!%p1476_p3)
}
  0x3a   : > { %s1480_s15 = scalar_lea.vmem %s1766_s18, 128  ;;  %p1488_p12 = scmp.lt.s32.totalorder %s1766_s18, %s1766_s18 }
  0x3b   : > { %p1481_p5 = scmp.ne.s32.totalorder %s1766_s18, %s1480_s15  ;;  %p1489_p0 = scmp.lt.s32.totalorder %s1480_s15, %s1480_s15 }
  0x3d   : > { %p1483_p7 = pnand %p1481_p5, %p1778_p13  ;;  %p1490_p1 = por %p1489_p0, %p1488_p12 }
  0x3f   : > { %p1484_p9 = pneg %p1483_p7 }
  0x41   : > { %p1491_p4 = pnand %p1490_p1, %p1484_p9 }
  0x43   : > { %1494 = shalt.err (!%p1491_p4)
}
  0x44   : > { %1288 = dma.hbm_to_vmem [thread:$0]  (!%p1762_p11), %s2074_s4, 128, %s1766_s18, [#allocation7]  }
  0x45   : > { %s1495_s22 = scalar_lea.hbm %s2076_s6, 4096 }
  0x46   : > { %p1496_p6 = scmp.ne.s32.totalorder %s2076_s6, %s1495_s22  ;;  %p1502_p5 = scmp.lt.u32.totalorder %s1495_s22, %s2076_s6 }
  0x48   : > { %p1498_p10 = pnand %p1496_p6, %p1778_p13 }
  0x4a   : > { %p1499_p3 = pneg %p1498_p10 }
  0x4c   : > { %p1504_p7 = pnand %p1502_p5, %p1499_p3 }
  0x4e   : > { %1507 = shalt.err (!%p1504_p7)
}
  0x4f   : > { %s1508_s19 = scalar_lea.vmem %s270_s20, 4096  ;;  %p1516_p1 = scmp.lt.s32.totalorder %s270_s20, %s270_s20 }
  0x50   : > { %p1509_p9 = scmp.ne.s32.totalorder %s270_s20, %s1508_s19  ;;  %p1517_p4 = scmp.lt.s32.totalorder %s1508_s19, %s1508_s19 }
  0x52   : > { %p1511_p12 = pnand %p1509_p9, %p1778_p13  ;;  %p1518_p8 = por %p1517_p4, %p1516_p1 }
  0x54   : > { %p1512_p0 = pneg %p1511_p12 }
  0x56   : > { %p1519_p2 = pnand %p1518_p8, %p1512_p0 }
  0x58   : > { %1522 = shalt.err (!%p1519_p2)
}
  0x59   : > { %s2085_s18 = smov 128   ;;  %s1651_s14 = smov 8  }
  0x5a   : > { %1291 = dma.hbm_to_vmem [thread:$0]  (!%p1762_p11), %s2076_s6, 4096, %s270_s20, [#allocation10], %s2085_s18, %s2085_s18, %s1651_s14  }
  0x5b   : > { %s46_s7 = sadd.s32 1, %s1631_s26  ;;  %s37_s24 = sadd.s32 1, %s1639_s28 }
  0x5c   : > { %p53_p2 = scmp.ne.s32.totalorder %s1631_s26, %s1627_s25  ;;  %p39_p8 = scmp.ge.s32.totalorder %s37_s24, 2 }
  0x5d   : > { %p54_p13 = scmp.eq.s32.totalorder %s1643_s29, 0  ;;  %p2097_p6 = scmp.ne.s32.totalorder %s2090_s10, 0 }
  0x5e   : > { %p1303_p3 = scmp.lt.s32.totalorder %s1643_s29, 2  ;;  %s2117_s24 = smov (%p39_p8, %s37_s24), 0 }
  0x5f   : > { %p1851_p10 = por %p2097_p6, %p53_p2  ;;  %p55_p5 = por %p54_p13, %p53_p2 }
  0x60   : > { %s283_s16 = sand.u32 1, %s1631_s26   ;;  %s41_s12 = ssub.s32 %s1639_s28, %s2117_s24 }
  0x61   : > { %p44_p7 = scmp.eq.s32.totalorder %s41_s12, 0  ;;  %s1263_s20 = smul.u32 40, %s283_s16 }
  0x62   : > { %s1264_s22 = smul.u32 640, %s1639_s28  ;;  %p1862_p11 = pnand %p1303_p3, %p55_p5 }
  0x63   : > { %s1867_s10 = scalar_select %p44_p7, %s1631_s26, %s46_s7  }
  0x64   : > { %s1872_s17 = scalar_lea.hbm %s2070_s0, %s1264_s22  ;;  %s287_s19 = scalar_lea.vmem [#allocation3], %s1263_s20 }
  0x65   : > { %s296_s21 = sshll.u32 %s287_s19, 4  ;;  %s1876_s15 = scalar_lea.sflag [#allocation4], %s283_s16  ;;  %s1874_s21 = int_to_ptr.vmem [resolvable:$true] %s296_s21 }
  0x66   : > { %s1523_s12 = scalar_lea.hbm %s1872_s17, 640  ;;  %p1525_p12 = pneg %p1862_p11 }
  0x67   : > { %p1524_p9 = scmp.ne.s32.totalorder %s1872_s17, %s1523_s12  ;;  %s1528_s30 = scalar_lea.hbm %s2070_s0, 1280 }
  0x68   : > { %p1529_p4 = scmp.lt.u32.totalorder %s1872_s17, %s2070_s0  ;;  %p1530_p2 = scmp.lt.u32.totalorder %s1528_s30, %s1523_s12 }
  0x69   : > { %p1526_p0 = pnand %p1525_p12, %p1524_p9  ;;  %p1532_p13 = scmp.lt.u32.totalorder %s1523_s12, %s1872_s17 }
  0x6a   : > { %p1531_p8 = por %p1530_p2, %p1529_p4 }
  0x6b   : > { %p1527_p1 = pneg %p1526_p0 }
  0x6c   : > { %p1533_p6 = por %p1532_p13, %p1531_p8 }
  0x6e   : > { %p1534_p3 = pnand %p1533_p6, %p1527_p1 }
  0x70   : > { %1537 = shalt.err (!%p1534_p3)
}
  0x71   : > { %s1538_s16 = scalar_lea.vmem %s1874_s21, 640  ;;  %s1652_s20 = smov [#allocation3]  }
  0x72   : > { %p1539_p5 = scmp.ne.s32.totalorder %s1874_s21, %s1538_s16  ;;  %s1543_s19 = sshll.u32 %s1652_s20, 4  ;;  %s1544_s19 = int_to_ptr.vmem [resolvable:$false] %s1543_s19 }
  0x73   : > { %s1545_s18 = scalar_lea.vmem %s1544_s19, 1280  ;;  %p1546_p0 = scmp.lt.s32.totalorder %s1874_s21, %s1544_s19 }
  0x74   : > { %p1541_p7 = pnand %p1539_p5, %p1525_p12  ;;  %p1547_p4 = scmp.lt.s32.totalorder %s1545_s18, %s1538_s16 }
  0x76   : > { %p1542_p9 = pneg %p1541_p7  ;;  %p1548_p2 = por %p1547_p4, %p1546_p0 }
  0x78   : > { %p1549_p8 = pnand %p1548_p2, %p1542_p9 }
  0x7a   : > { %1552 = shalt.err (!%p1549_p8)
}
  0x7b   : > { %s2100_s12 = smov 128   ;;  %p2101_p12 = scmp.ne.s32.totalorder %s2094_s13, 0 }
  0x7c   : > { %1295 = dma.hbm_to_vmem [thread:$0]  (!%p1862_p11), %s1872_s17, 640, %s1874_s21, %s1876_s15, %s2100_s12, %s2100_s12, %s1651_s14  }
  0x7d   : > { %308 = sbr.rel (%p2101_p12) target bundleno = 1047 (0x417), region = 48  ;;  %s1910_s7 = sand.u32 (!%p2101_p12), 1, %s1627_s25  }
  0x7e   : > { %s1265_s22 = smul.u32 (!%p2101_p12), 40, %s1910_s7  ;;  %s311_s30 = scalar_lea.sflag (!%p2101_p12), [#allocation4], %s1910_s7 }
  0x7f   : > { %p2102_p1 = scmp.ne.s32.totalorder (!%p2101_p12), %s2091_s11, 0 }
  0x80   : > { %s314_s8 = scalar_lea.vmem (!%p2101_p12), [#allocation3], %s1265_s22 }
  0x84   : > { %1606 = dma.done.wait (%p2102_p1), %s311_s30, 640  }
  0x85   : > { %1608 = vsyncadd (%p2102_p1), %s311_s30, 4294966656  ;;  %p2103_p13 = scmp.ne.s32.totalorder %s2089_s9, 0 }
  0x87   : > { %1610 = dma.done.wait (%p2103_p13), [#allocation7], 384  }
  0x88   : > { %1612 = vsyncadd (%p2103_p13), [#allocation7], 4294966912 }
  0x89   : > { %1614 = dma.done.wait (%p2103_p13), [#allocation10], 4096  }
  0x8a   : > { %1616 = vsyncadd (%p2103_p13), [#allocation10], 4294963200  ;;  %v1653_v0 = vmov 0   ;;  %v1366_v1 = vld [vmem:[%s314_s8 + $0x4] ss:$8 sps:$4 sm:$0xff]   ;;  %vm438_vm0 = vcmask 1043456   ;;  %v527_v26 = vlaneseq }
  0x8b   : > { %477 = vmatprep.mubr.bf16.mxu0 %v1653_v0  ;;  %v1368_v2 = vld [vmem:[%s314_s8] ss:$8 sps:$4 sm:$0xff]   ;;  %445 = vmatprep.subr.bf16.mxu0 %v1366_v1  ;;  %v1369_v3 = vld [vmem:[%s314_s8 + $0x14] ss:$8 sps:$4 sm:$0xff]   ;;  %v1371_v5 = vld [vmem:[%s314_s8 + $0x10] ss:$8 sps:$4 sm:$0xff]  }
  0x8c   : > { %v364_v4 = vld [vmem:[%s314_s8 + $0x20] sm:$0xff]  ;;  %446 = vmatpush1.bf16.msra.mxu0 %v1368_v2  ;;  %vm422_vm1 = vcmask 326656   ;;  %v1376_v11 = vld [vmem:[%s2071_s1 + $0x10] sm:$0xff]   ;;  %v528_v27 = vshrl.u32 %v527_v26, 7  ;;  %vm969_vm2 = vcmask 261120   ;;  %s1181_s12 = sshll.u32 %s1910_s7, 6 }
  0x8d   : > { %447 = vmatprep.subr.bf16.mxu0 %v1369_v3  ;;  %v1192_v6 = vcombine.high %v364_v4, %v364_v4  ;;  %v1191_v7 = vcombine.low %v364_v4, %v364_v4  ;;  %v1374_v9 = vld [vmem:[%s2071_s1] sm:$0xff]   ;;  %v1375_v10 = vld [vmem:[%s2071_s1 + $0x8] sm:$0xff]   ;;  %s2104_s17 = sld [smem:[#allocation17_spill]]  ;;  %s356_s21 = scalar_lea.vmem [#allocation11], %s1181_s12 }
  0x8e   : > { %v1378_v12 = vld [vmem:[#allocation9 + $0x4] ss:$8 sps:$4 sm:$0xff]   ;;  %v1380_v13 = vld [vmem:[#allocation9] ss:$8 sps:$4 sm:$0xff]   ;;  %v1381_v14 = vld [vmem:[#allocation9 + $0x14] ss:$8 sps:$4 sm:$0xff]  }
  0x8f   : > { %v440_v8 = vsel %vm438_vm0, %v1191_v7, 0  ;;  %848 = vmatprep.subr.bf16.mxu1 %v1378_v12  ;;  %v1383_v15 = vld [vmem:[#allocation9 + $0x10] ss:$8 sps:$4 sm:$0xff]   ;;  %v1384_v16 = vld [vmem:[#allocation9 + $0x24] ss:$8 sps:$4 sm:$0xff]   ;;  %v1944_v28 = vsub.s32 0, %v528_v27 }
  0x90   : > { %448 = vmatpush1.bf16.msra.mxu0 %v1371_v5  ;;  %849 = vmatpush1.bf16.msra.mxu1 %v1380_v13  ;;  %v1386_v17 = vld [vmem:[#allocation9 + $0x20] ss:$8 sps:$4 sm:$0xff]   ;;  %v1387_v18 = vld [vmem:[#allocation9 + $0x34] ss:$8 sps:$4 sm:$0xff]   ;;  %v1389_v19 = vld [vmem:[#allocation9 + $0x30] ss:$8 sps:$4 sm:$0xff]  }
  0x91   : > { %1193 = vmatprep.subr.msk.bf16.mxu0 %vm438_vm0, %v1192_v6  ;;  %850 = vmatprep.subr.bf16.mxu1 %v1381_v14  ;;  %v1390_v20 = vld [vmem:[#allocation9 + $0x44] ss:$8 sps:$4 sm:$0xff]   ;;  %v1392_v21 = vld [vmem:[#allocation9 + $0x40] ss:$8 sps:$4 sm:$0xff]   ;;  %v1393_v22 = vld [vmem:[#allocation9 + $0x54] ss:$8 sps:$4 sm:$0xff]  }
  0x92   : > { %v1395_v23 = vld [vmem:[#allocation9 + $0x50] ss:$8 sps:$4 sm:$0xff]   ;;  %v1396_v24 = vld [vmem:[#allocation9 + $0x64] ss:$8 sps:$4 sm:$0xff]   ;;  %v1398_v25 = vld [vmem:[#allocation9 + $0x60] ss:$8 sps:$4 sm:$0xff]  }
  0x93   : > { %v526_v29 = vld [vmem:[#allocation8] sm:$0xff]  ;;  %v1403_v44 = vld [vmem:[#allocation9 + $0x84] ss:$8 sps:$4 sm:$0xff]   ;;  %v1405_v45 = vld [vmem:[#allocation9 + $0x80] ss:$8 sps:$4 sm:$0xff]   ;;  %s1053_s20 = sshll.u32 %s356_s21, 4  ;;  %s2016_s20 = int_to_ptr.vmem [resolvable:$true] %s1053_s20 }
  0x94   : > { %450 = vmatpush1.bf16.msra.mxu0 %v440_v8  ;;  %851 = vmatpush1.bf16.msra.mxu1 %v1383_v15  ;;  %v536_v31 = vcombine.high %v526_v29, %v526_v29  ;;  %v1400_v42 = vld [vmem:[#allocation9 + $0x74] ss:$8 sps:$4 sm:$0xff]   ;;  %v1402_v43 = vld [vmem:[#allocation9 + $0x70] ss:$8 sps:$4 sm:$0xff]   ;;  %v1409_v48 = vld [vmem:[#allocation9 + $0xa4] ss:$8 sps:$4 sm:$0xff]  }
  0x95   : > { %852 = vmatprep.subr.bf16.mxu1 %v1384_v16  ;;  %v1406_v46 = vld [vmem:[#allocation9 + $0x94] ss:$8 sps:$4 sm:$0xff]   ;;  %v1408_v47 = vld [vmem:[#allocation9 + $0x90] ss:$8 sps:$4 sm:$0xff]   ;;  %v1411_v49 = vld [vmem:[#allocation9 + $0xa0] ss:$8 sps:$4 sm:$0xff]  }
  0x96   : > { %v1412_v50 = vld [vmem:[#allocation9 + $0xb4] ss:$8 sps:$4 sm:$0xff]   ;;  %v1414_v51 = vld [vmem:[#allocation9 + $0xb0] ss:$8 sps:$4 sm:$0xff]   ;;  %v1415_v52 = vld [vmem:[#allocation9 + $0xc4] ss:$8 sps:$4 sm:$0xff]  }
  0x97   : > { %1194 = vmatmul.mubr.msk.bf16.vlgmr.msra.gmra.mrb[0].mxu0 %vm422_vm1, %v1374_v9  ;;  %v1417_v53 = vld [vmem:[#allocation9 + $0xc0] ss:$8 sps:$4 sm:$0xff]   ;;  %v1418_v54 = vld [vmem:[#allocation9 + $0xd4] ss:$8 sps:$4 sm:$0xff]   ;;  %v1420_v56 = vld [vmem:[#allocation9 + $0xd0] ss:$8 sps:$4 sm:$0xff]  }
  0x98   : > { %487 = vmatprep.mubr.bf16.mxu0 %v1653_v0  ;;  %853 = vmatpush1.bf16.msra.mxu1 %v1386_v17  ;;  %v1421_v58 = vld [vmem:[#allocation9 + $0xe4] ss:$8 sps:$4 sm:$0xff]   ;;  %v1423_v60 = vld [vmem:[#allocation9 + $0xe0] ss:$8 sps:$4 sm:$0xff]   ;;  %v1424_v1 = vld [vmem:[#allocation9 + $0xf4] ss:$8 sps:$4 sm:$0xff]  }
  0x99   : > { %854 = vmatprep.subr.bf16.mxu1 %v1387_v18  ;;  %v1426_v2 = vld [vmem:[#allocation9 + $0xf0] ss:$8 sps:$4 sm:$0xff]   ;;  %s1256_s12 = sshll.u32 %s2104_s17, 10  ;;  %s2105_s14 = sld [smem:[#allocation19_spill]] }
  0x9a   : > { %v1427_v5 = vld [vmem:[%s2071_s1 + $0x18] sm:$0xff]   ;;  %v1428_v6 = vld [vmem:[%s2071_s1 + $0x20] ss:$0 sps:$4 sm:$0xff]   ;;  %s1038_s17 = scalar_lea.sflag [#allocation5], %s1910_s7  ;;  %s1553_s15 = scalar_lea.vmem %s2016_s20, 1024 }
  0x9b   : > { %v545_v7 = vld [vmem:[%s2075_s5] sm:$0xff]  ;;  %p1554_p11 = scmp.ne.s32.totalorder %s2016_s20, %s1553_s15  ;;  %s1654_s16 = smov [#allocation11]  }
  0x9c   : > { %855 = vmatpush1.bf16.msra.mxu1 %v1389_v19  ;;  %v547_v8 = vcombine.high %v545_v7, %v545_v7  ;;  %s1557_s19 = sshll.u32 %s1654_s16, 4  ;;  %s1558_s19 = int_to_ptr.vmem [resolvable:$false] %s1557_s19 }
  0x9d   : > { %856 = vmatprep.subr.bf16.mxu1 %v1390_v20  ;;  %p1555_p6 = pnand %p1554_p11, %p1851_p10  ;;  %s1559_s18 = scalar_lea.vmem %s1558_s19, 2048 }
  0x9e   : > { %p1560_p5 = scmp.lt.s32.totalorder %s2016_s20, %s1558_s19  ;;  %p1561_p7 = scmp.lt.s32.totalorder %s1559_s18, %s1553_s15 }
  0x9f   : > { %1195 = vmatmul.mubr.msk.bf16.gmra.mrb[4].mxu0 %vm422_vm1, %v1375_v10  ;;  %s2021_s23 = scalar_lea.hbm %s2105_s14, %s1256_s12  ;;  %p1556_p3 = pneg %p1555_p6 }
  0xa0   : > { %497 = vmatprep.mubr.bf16.mxu0 %v1653_v0  ;;  %857 = vmatpush1.bf16.msra.mxu1 %v1392_v21  ;;  %p1562_p9 = por %p1561_p7, %p1560_p5 }
  0xa1   : > { %858 = vmatprep.subr.bf16.mxu1 %v1393_v22 }
  0xa2   : > { %p1563_p0 = pnand %p1562_p9, %p1556_p3 }
  0xa4   : > { %859 = vmatpush1.bf16.msra.mxu1 %v1395_v23 }
  0xa5   : > { %860 = vmatprep.subr.bf16.mxu1 %v1396_v24 }
  0xa7   : > { %1196 = vmatmul.mubr.msk.bf16.gmra.mrb[8].mxu0 %vm422_vm1, %v1376_v11 }
  0xa8   : > { %507 = vmatprep.mubr.bf16.mxu0 %v1653_v0  ;;  %861 = vmatpush1.bf16.msra.mxu1 %v1398_v25 }
  0xa9   : > { %862 = vmatprep.subr.bf16.mxu1 %v1400_v42 }
  0xac   : > { %863 = vmatpush1.bf16.msra.mxu1 %v1402_v43 }
  0xad   : > { %864 = vmatprep.subr.bf16.mxu1 %v1403_v44 }
  0xaf   : > { %1197 = vmatmul.mubr.msk.bf16.gmra.mrb[12].mxu0 %vm422_vm1, %v1427_v5 }
  0xb0   : > { %865 = vmatpush1.bf16.msra.mxu1 %v1405_v45  ;;  %517 = vmatprep.mubr.bf16.mxu0 %v1653_v0 }
  0xb1   : > { %866 = vmatprep.subr.bf16.mxu1 %v1406_v46 }
  0xb4   : > { %867 = vmatpush1.bf16.msra.mxu1 %v1408_v47 }
  0xb5   : > { %868 = vmatprep.subr.bf16.mxu1 %v1409_v48 }
  0xb7   : > { %1198 = vmatmul.mubr.msk.bf16.gmra.mrb[16].mxu0 %vm422_vm1, %v1428_v6 }
  0xb8   : > { %869 = vmatpush1.bf16.msra.mxu1 %v1411_v49  ;;  %1008 = vmatprep.mubr.bf16.mxu0 %v1653_v0 }
  0xb9   : > { %870 = vmatprep.subr.bf16.mxu1 %v1412_v50 }
  0xbc   : > { %871 = vmatpush1.bf16.msra.mxu1 %v1414_v51 }
  0xbd   : > { %872 = vmatprep.subr.bf16.mxu1 %v1415_v52 }
  0xc0   : > { %873 = vmatpush1.bf16.msra.mxu1 %v1417_v53 }
  0xc1   : > { %874 = vmatprep.subr.bf16.mxu1 %v1418_v54 }
  0xc4   : > { %875 = vmatpush1.bf16.msra.mxu1 %v1420_v56 }
  0xc5   : > { %876 = vmatprep.subr.bf16.mxu1 %v1421_v58 }
  0xc8   : > { %877 = vmatpush1.bf16.msra.mxu1 %v1423_v60 }
  0xc9   : > { %878 = vmatprep.subr.bf16.mxu1 %v1424_v1 }
  0xcc   : > { %879 = vmatpush1.bf16.msra.mxu1 %v1426_v2 }
 0x16a   : > { %v1946_v30 = vpop.f32.mrb[0].mxu0 }
 0x16b   : > { %v530_v32 = vrot.slane %v1946_v30, %v1944_v28  ;;  %v1950_v33 = vpop.f32.mrb[1].mxu0 }
 0x16c   : > { %v534_v34 = vrot.slane %v1950_v33, %v1944_v28  ;;  %v1954_v35 = vpop.f32.mrb[2].mxu0 }
 0x16d   : > { %v1956_v36 = vpop.f32.mrb[3].mxu0  ;;  %v538_v37 = vadd.f32 %v530_v32, %v526_v29 }
 0x16e   : > { %v539_v38 = vadd.f32 %v536_v31, %v534_v34 }
 0x16f   : > { %v540_v39 = vsel %vm438_vm0, %v538_v37, -inf }
 0x170   : > { %v541_v40 = vsel %vm438_vm0, %v539_v38, -inf }
 0x171   : > { %v542_v41 = vmax.f32 %v540_v39, %v541_v40 }
 0x172   : > { %v489_v55 = vpop.f32.mrb[4].mxu0 }
 0x173   : > { %543 = vmax.xlane.f32.xlu0 %v542_v41  ;;  %v491_v57 = vpop.f32.mrb[5].mxu0 }
 0x174   : > { %v493_v59 = vpop.f32.mrb[6].mxu0 }
 0x175   : > { %v495_v61 = vpop.f32.mrb[7].mxu0 }
 0x17a   : > { %v499_v62 = vpop.f32.mrb[8].mxu0 }
 0x17b   : > { %v501_v63 = vpop.f32.mrb[9].mxu0 }
 0x17c   : > { %v1960_v3 = vpop.f32.mrb[10].mxu0 }
 0x17d   : > { %v1962_v4 = vpop.f32.mrb[11].mxu0 }
 0x200   : > { %v544_v9 = vpop.xlane.xlu0 %543 }
 0x201   : > { %v549_v10 = vmul.f32 %v545_v7, %v544_v9  ;;  %v550_v11 = vmul.f32 %v547_v8, %v544_v9  ;;  %v911_v9 = vmax.f32 %v1960_v3, 0.0 }
 0x203   : > { %v551_v12 = vsel %vm438_vm0, %v549_v10, 0.0  ;;  %v558_v13 = vsel %vm438_vm0, %v550_v11, 0.0  ;;  %v912_v10 = vmax.f32 %v1962_v4, 0.0 }
 0x204   : > { %v552_v14 = vrot.slane %v551_v12, 4  ;;  %v559_v15 = vrot.slane %v558_v13, 4 }
 0x206   : > { %v553_v16 = vadd.f32 %v552_v14, %v551_v12  ;;  %v560_v17 = vadd.f32 %v559_v15, %v558_v13 }
 0x208   : > { %v554_v18 = vrot.slane %v553_v16, 2  ;;  %v561_v19 = vrot.slane %v560_v17, 2 }
 0x20a   : > { %v555_v20 = vadd.f32 %v554_v18, %v553_v16  ;;  %v562_v21 = vadd.f32 %v561_v19, %v560_v17 }
 0x20c   : > { %v556_v22 = vrot.slane %v555_v20, 1  ;;  %v563_v23 = vrot.slane %v562_v21, 1 }
 0x20e   : > { %v557_v24 = vadd.f32 %v556_v22, %v555_v20  ;;  %v564_v25 = vadd.f32 %v563_v23, %v562_v21 }
 0x210   : > { %v565_v26 = vsub.f32 %v1946_v30, %v557_v24  ;;  %v566_v27 = vsub.f32 %v1950_v33, %v564_v25 }
 0x212   : > { %v567_v29 = vmul.f32 1.442695, %v565_v26  ;;  %v569_v31 = vmul.f32 1.442695, %v566_v27 }
 0x214   : > { %1431 = vpow2.f32 %v567_v29 }
 0x215   : > { %1433 = vpow2.f32 %v569_v31 }
 0x21e   : > { %v1432_v32 = vpop.eup %1431 }
 0x21f   : > { %v1434_v34 = vpop.eup %1433  ;;  %v574_v37 = vrot.slane %v1432_v32, %v1944_v28 }
 0x220   : > { %v578_v38 = vrot.slane %v1434_v34, %v1944_v28 }
 0x221   : > { %v579_v39 = vmul.f32 %v574_v37, %v1954_v35  ;;  %v581_v40 = vmul.f32 %v574_v37, %v489_v55  ;;  %v583_v41 = vmul.f32 %v574_v37, %v493_v59  ;;  %v585_v42 = vmul.f32 %v574_v37, %v499_v62  ;;  %v509_v35 = vpop.f32.mrb[12].mxu0 }
 0x222   : > { %v582_v43 = vmul.f32 %v578_v38, %v491_v57  ;;  %v584_v44 = vmul.f32 %v578_v38, %v495_v61  ;;  %v586_v30 = vmul.f32 %v578_v38, %v501_v63  ;;  %v580_v33 = vmul.f32 %v578_v38, %v1956_v36  ;;  %v511_v51 = vpop.f32.mrb[13].mxu0 }
 0x223   : > { %v1257_v45 = vpack.c.bf16 %v581_v40, %v579_v39  ;;  %v1259_v46 = vpack.c.bf16 %v585_v42, %v583_v41  ;;  %v1262_v49 = vpack.c.bf16 %v578_v38, %v578_v38  ;;  %v1261_v50 = vpack.c.bf16 %v574_v37, %v574_v37  ;;  %v513_v52 = vpop.f32.mrb[14].mxu0  ;;  %v1429_v42 = vld [vmem:[#allocation6] sm:$0xff]  }
 0x224   : > { %v1260_v47 = vpack.c.bf16 %v586_v30, %v584_v44  ;;  %v1258_v48 = vpack.c.bf16 %v582_v43, %v580_v33  ;;  %v515_v53 = vpop.f32.mrb[15].mxu0  ;;  %v913_v13 = vmax.f32 %v509_v35, 0.0  ;;  %v914_v14 = vmax.f32 %v511_v51, 0.0  ;;  %v1430_v43 = vld [vmem:[#allocation6 + $0x8] sm:$0xff]   ;;  %v951_v44 = vld [vmem:[%s2073_s3] sm:$0xff]  ;;  %v952_v30 = vld [vmem:[%s2073_s3 + $0x8] sm:$0xff] }
 0x225   : > { %v519_v54 = vpop.f32.mrb[16].mxu0  ;;  %v915_v17 = vmax.f32 %v513_v52, 0.0  ;;  %v916_v18 = vmax.f32 %v515_v53, 0.0  ;;  %v955_v52 = vld [vmem:[%s2073_s3 + $0x20] sm:$0xff]  ;;  %v956_v53 = vld [vmem:[%s2073_s3 + $0x28] sm:$0xff] }
 0x226   : > { %880 = vmatprep.mubr.bf16.mxu1 %v1258_v48  ;;  %v521_v55 = vpop.f32.mrb[17].mxu0  ;;  %v917_v15 = vmax.f32 %v519_v54, 0.0 }
 0x227   : > { %881 = vmatmul.mubr.bf16.vlgmr.msra.gmra.mrb[0].mxu1 %v1257_v45  ;;  %v523_v56 = vpop.f32.mrb[18].mxu0  ;;  %v918_v19 = vmax.f32 %v521_v55, 0.0  ;;  %v953_v45 = vld [vmem:[%s2073_s3 + $0x10] sm:$0xff] }
 0x228   : > { %890 = vmatprep.mubr.bf16.mxu1 %v1260_v47  ;;  %v524_v36 = vpop.f32.mrb[19].mxu0  ;;  %v957_v55 = vld [vmem:[%s2073_s3 + $0x30] sm:$0xff] }
 0x22f   : > { %891 = vmatmul.mubr.bf16.gmra.mrb[4].mxu1 %v1259_v46 }
 0x230   : > { %900 = vmatprep.mubr.bf16.mxu1 %v1262_v49 }
 0x237   : > { %901 = vmatmul.mubr.bf16.gmra.mrb[8].mxu1 %v1261_v50 }
 0x2fa   : > { %v882_v57 = vpop.f32.mrb[0].mxu1 }
 0x2fb   : > { %v884_v58 = vpop.f32.mrb[1].mxu1 }
 0x2fc   : > { %v886_v59 = vpop.f32.mrb[2].mxu1 }
 0x2fd   : > { %v888_v60 = vpop.f32.mrb[3].mxu1 }
 0x302   : > { %v892_v61 = vpop.f32.mrb[4].mxu1 }
 0x303   : > { %v894_v62 = vpop.f32.mrb[5].mxu1 }
 0x304   : > { %v896_v63 = vpop.f32.mrb[6].mxu1 }
 0x305   : > { %v898_v1 = vpop.f32.mrb[7].mxu1 }
 0x30a   : > { %v902_v2 = vpop.f32.mrb[8].mxu1 }
 0x30b   : > { %1435 = vrcp.f32 %v902_v2  ;;  %v904_v5 = vpop.f32.mrb[9].mxu1 }
 0x30c   : > { %1437 = vrcp.f32 %v904_v5  ;;  %v906_v6 = vpop.f32.mrb[10].mxu1 }
 0x30d   : > { %v907_v7 = vpop.f32.mrb[11].mxu1 }
 0x315   : > { %v1436_v8 = vpop.eup %1435 }
 0x316   : > { %v1438_v11 = vpop.eup %1437  ;;  %v922_v12 = vrot.slane %v1436_v8, %v1944_v28 }
 0x317   : > { %v926_v16 = vrot.slane %v1438_v11, %v1944_v28 }
 0x318   : > { %v927_v20 = vmul.f32 %v922_v12, %v882_v57  ;;  %v929_v21 = vmul.f32 %v922_v12, %v886_v59  ;;  %v931_v22 = vmul.f32 %v922_v12, %v892_v61  ;;  %v933_v23 = vmul.f32 %v922_v12, %v896_v63  ;;  %v958_v57 = vld [vmem:[%s2073_s3 + $0x38] sm:$0xff] }
 0x319   : > { %v930_v24 = vmul.f32 %v926_v16, %v888_v60  ;;  %v932_v25 = vmul.f32 %v926_v16, %v894_v62  ;;  %v934_v3 = vmul.f32 %v926_v16, %v898_v1  ;;  %v928_v26 = vmul.f32 %v926_v16, %v884_v58 }
 0x31a   : > { %v935_v4 = vmul.f32 %v927_v20, %v911_v9  ;;  %v937_v27 = vmul.f32 %v929_v21, %v913_v13  ;;  %v939_v29 = vmul.f32 %v931_v22, %v915_v17  ;;  %v941_v31 = vmul.f32 %v933_v23, %v917_v15 }
 0x31b   : > { %v938_v32 = vmul.f32 %v930_v24, %v914_v14  ;;  %v940_v34 = vmul.f32 %v932_v25, %v916_v18  ;;  %v942_v37 = vmul.f32 %v934_v3, %v918_v19  ;;  %v936_v28 = vmul.f32 %v928_v26, %v912_v10 }
 0x31c   : > { %v947_v38 = vpack.c.bf16 %v937_v27, %v935_v4  ;;  %v949_v39 = vpack.c.bf16 %v941_v31, %v939_v29 }
 0x31d   : > { %v948_v40 = vpack.c.bf16 %v938_v32, %v936_v28  ;;  %v950_v41 = vpack.c.bf16 %v942_v37, %v940_v34 }
 0x31f   : > { %976 = vmatprep.subr.bf16.mxu0 %v948_v40 }
 0x320   : > { %977 = vmatpush1.bf16.msra.mxu0 %v947_v38 }
 0x321   : > { %978 = vmatprep.subr.bf16.mxu0 %v950_v41 }
 0x324   : > { %979 = vmatpush1.bf16.msra.mxu0 %v949_v39 }
 0x327   : > { %1244 = vmatmul.mubr.msk.bf16.vlgmr.msra.gmra.mrb[20].mxu0 %vm969_vm2, %v1429_v42 }
 0x328   : > { %1018 = vmatprep.mubr.bf16.mxu0 %v1653_v0  ;;  %v954_v0 = vld [vmem:[%s2073_s3 + $0x18] sm:$0xff] }
 0x32f   : > { %1245 = vmatmul.mubr.msk.bf16.gmra.mrb[24].mxu0 %vm969_vm2, %v1430_v43 }
 0x3fa   : > { %v1010_v33 = vpop.f32.mrb[20].mxu0 }
 0x3fb   : > { %v1011_v46 = vadd.f32 %v1010_v33, %v951_v44  ;;  %v1012_v47 = vpop.f32.mrb[21].mxu0 }
 0x3fc   : > { %v1013_v48 = vadd.f32 %v1012_v47, %v952_v30  ;;  %v1014_v49 = vpop.f32.mrb[22].mxu0 }
 0x3fd   : > { %1029 = vst [vmem:[%s356_s21] sm:$0xff] %v1011_v46  ;;  %v1015_v50 = vadd.f32 %v1014_v49, %v953_v45  ;;  %v1016_v35 = vpop.f32.mrb[23].mxu0 }
 0x3fe   : > { %1030 = vst [vmem:[%s356_s21 + $0x8] sm:$0xff] %v1013_v48  ;;  %v1017_v51 = vadd.f32 %v1016_v35, %v954_v0 }
 0x3ff   : > { %1031 = vst [vmem:[%s356_s21 + $0x10] sm:$0xff] %v1015_v50 }
 0x400   : > { %1032 = vst [vmem:[%s356_s21 + $0x18] sm:$0xff] %v1017_v51 }
 0x402   : > { %v1020_v54 = vpop.f32.mrb[24].mxu0 }
 0x403   : > { %v1021_v56 = vadd.f32 %v1020_v54, %v955_v52  ;;  %v1022_v36 = vpop.f32.mrb[25].mxu0 }
 0x404   : > { %v1023_v58 = vadd.f32 %v1022_v36, %v956_v53  ;;  %v1024_v59 = vpop.f32.mrb[26].mxu0 }
 0x405   : > { %1033 = vst [vmem:[%s356_s21 + $0x20] sm:$0xff] %v1021_v56  ;;  %v1025_v60 = vadd.f32 %v1024_v59, %v957_v55  ;;  %v1026_v61 = vpop.f32.mrb[27].mxu0 }
 0x406   : > { %1034 = vst [vmem:[%s356_s21 + $0x28] sm:$0xff] %v1023_v58  ;;  %v1027_v62 = vadd.f32 %v1026_v61, %v958_v57 }
 0x407   : > { %1035 = vst [vmem:[%s356_s21 + $0x30] sm:$0xff] %v1025_v60 }
 0x408   : > { %1036 = vst [vmem:[%s356_s21 + $0x38] sm:$0xff] %v1027_v62 }
 0x409   : > { %1566 = shalt.err (!%p1563_p0)
}
 0x40a   : > { %s1567_s21 = scalar_lea.hbm %s2021_s23, 1024  ;;  %s1571_s12 = scalar_lea.hbm %s2105_s14, 2048 }
 0x40b   : > { %p1568_p4 = scmp.ne.s32.totalorder %s2021_s23, %s1567_s21  ;;  %p1572_p12 = scmp.lt.u32.totalorder %s2021_s23, %s2105_s14 }
 0x40c   : > { %p1573_p1 = scmp.lt.u32.totalorder %s1571_s12, %s1567_s21  ;;  %p1575_p11 = scmp.lt.u32.totalorder %s1567_s21, %s2021_s23 }
 0x40d   : > { %p1569_p2 = pnand %p1568_p4, %p1851_p10 }
 0x40e   : > { %p1574_p13 = por %p1573_p1, %p1572_p12 }
 0x40f   : > { %p1570_p8 = pneg %p1569_p2 }
 0x410   : > { %p1576_p6 = por %p1575_p11, %p1574_p13 }
 0x412   : > { %p1577_p3 = pnand %p1576_p6, %p1570_p8 }
 0x414   : > { %1580 = shalt.err (!%p1577_p3)
}
 0x415   : > { %s1655_s11 = smov 256   ;;  %s1656_s13 = smov 16  }
 0x416   : > { %1280 = dma.vmem_to_hbm [thread:$0]  (%p1851_p10), %s2016_s20, 1024, %s2021_s23, %s1038_s17, %s1655_s11, %s1655_s11, %s1656_s13  }
 0x417 PF: > { %s2106_s15 = sld [smem:[#allocation16_spill]]  ;;  %s2107_s16 = sld [smem:[#allocation18_spill]] }
 0x418   : > { %p2109_p7 = scmp.ge.s32.totalorder %s1643_s29, 2 }
 0x41d   : > { %s1068_s19 = sand.u32 1, %s2106_s15   ;;  %p2108_p5 = scmp.ne.s32.totalorder %s2107_s16, 0 }
 0x41e   : > { %s1069_s18 = scalar_lea.sflag [#allocation5], %s1068_s19 }
 0x41f   : > { %p1297_p9 = pnand %p2109_p7, %p2108_p5 }
 0x421   : > { %1618 = dma.done.wait (!%p1297_p9), %s1069_s18, 1024  }
 0x422   : > { %1620 = vsyncadd (!%p1297_p9), %s1069_s18, 4294966272  ;;  %s25_s29 = sadd.s32 1, %s1643_s29   ;;  %s2110_s7 = smov %s2117_s24 }
 0x423   : > { %p22_p0 = scmp.ge.s32.totalorder %s25_s29, 4   ;;  %s2111_s24 = smov %s1627_s25 }
 0x424   : > { %s2112_s25 = smov %s1631_s26  ;;  %s2113_s26 = smov %s1867_s10 }
 0x425   : > { %s2114_s27 = smov %s1639_s28  ;;  %s2115_s28 = smov %s2110_s7 }
 0x426   :  { %24 = sbr.rel (!%p22_p0) target bundleno = 10 (0xa), region = 105 }
 0x42d   :  { %1074 = vsyncpa [#allocation4], 1 }
 0x42e   :  { %1076 = vsyncpa [#allocation4 + $0x1], 1 }
 0x42f   :  { %1077 = vsyncpa [#allocation7], 1 }
 0x430   :  { %1078 = vsyncpa [#allocation10], 1 }
 0x431   :  { %1079 = vsyncpa [#allocation5], 1 }
 0x432   :  { %1081 = vsyncpa [#allocation5 + $0x1], 1 }

</bundles_post_ra>
